<compile_context>
chip_gen: v5e
topology: v5e:2x2
jax: 0.10.0
libtpu: 0.0.40
codegen_flags: <defaults>
</compile_context>

<pallas_src>
import jax
import jax.numpy as jnp
from jax import lax
from jax.experimental import pallas as pl
from jax.experimental.pallas import tpu as pltpu

IN_F = 17      # input features
HID = 200      # true hidden width of the PyTorch module
HID_P = 256    # hidden width padded to a full lane multiple (zero-padded)


def bp_forward_kernel(x_ref, w1_ref, w2_ref, w3_ref, vec_ref, b3_ref, o_ref):
    """One batch tile: x (tb,17) bf16 -> o (1,1,tb) f32, lane-dense over the batch."""
    x = x_ref[...]                                   # (tb, 17) bf16
    v = vec_ref[...]                                 # (8, 256) f32 packed per-channel params
    b1 = v[0:1, :]                                   # (1, 256)
    a1 = v[1:2, :]
    b2 = v[2:3, :]
    a2 = v[3:4, :]

    # fc1: Linear(17, 200) + PReLU   (MXU bf16 -> f32 acc, VPU f32)
    h1 = jnp.dot(x, w1_ref[...], preferred_element_type=jnp.float32) + b1
    h1 = jnp.where(h1 > 0, h1, a1 * h1)

    # fc2: Linear(200, 200) + PReLU  (MXU bf16 -> f32 acc, VPU f32)
    h2 = jnp.dot(h1.astype(jnp.bfloat16), w2_ref[...],
                 preferred_element_type=jnp.float32) + b2
    h2 = jnp.where(h2 > 0, h2, a2 * h2)

    # output: Linear(200, 1) as an NT matmul so the batch lands on the lane axis:
    #   (8, 256) @ (tb, 256)^T -> (8, tb);  row 0 holds y for all tb rows of this tile.
    r = lax.dot_general(w3_ref[...], h2.astype(jnp.bfloat16),
                        (((1,), (1,)), ((), ())),
                        preferred_element_type=jnp.float32)     # (8, tb)
    y = r[0:1, :] + b3_ref[0, 0]                                # (1, tb), b3 scalar from SMEM

    o_ref[...] = y[None]                                        # (1, 1, tb) lane-dense store


def _round_up(n, m):
    return ((n + m - 1) // m) * m


def bp_forward(x, params, *, tile_b=2048):
    """x: [B, 17] float32 -> [B, 1] float32."""
    w1, w2, w3m, vec, b3 = params
    B = x.shape[0]

    # Balanced batch tiles: n_tiles = ceil(B / tile_b), tb = ceil(B / n_tiles) rounded up to
    # a sublane-friendly granule (128 for big batches -> fully unmasked lane-dense stores).
    n_tiles = max(1, -(-B // tile_b))
    tb = -(-B // n_tiles)
    gran = 128 if tb >= 128 else 16
    tb = _round_up(tb, gran)
    Bp = n_tiles * tb

    xb = x.astype(jnp.bfloat16)
    if Bp != B:
        xb = jnp.pad(xb, ((0, Bp - B), (0, 0)))      # padded rows are sliced off below

    out = pl.pallas_call(
        bp_forward_kernel,
        out_shape=jax.ShapeDtypeStruct((n_tiles, 1, tb), jnp.float32),
        grid=(n_tiles,),
        in_specs=[
            pl.BlockSpec((tb, IN_F), lambda i: (i, 0)),            # activations: batch-tiled
            pl.BlockSpec((IN_F, HID_P), lambda i: (0, 0)),         # w1 (bf16): VMEM-resident
            pl.BlockSpec((HID_P, HID_P), lambda i: (0, 0)),        # w2 (bf16): VMEM-resident
            pl.BlockSpec((8, HID_P), lambda i: (0, 0)),            # w3 row (bf16)
            pl.BlockSpec((8, HID_P), lambda i: (0, 0)),            # packed b1/a1/b2/a2 (f32)
            pl.BlockSpec(memory_space=pltpu.MemorySpace.SMEM),     # b3 scalar (1,1) f32
        ],
        out_specs=pl.BlockSpec((1, 1, tb), lambda i: (i, 0, 0)),
        compiler_params=pltpu.CompilerParams(
            dimension_semantics=("parallel",),                     # split batch across v7x TCs
        ),
    )(xb, w1, w2, w3m, vec, b3)

    return out.reshape(Bp)[:B].reshape(B, 1)


def init_params(key):
    """Deterministic parameter init matching the shapes of the PyTorch module (f32, unpadded)."""
    k1, k2, k3, k4, k5, k6 = jax.random.split(key, 6)
    w1 = jax.random.uniform(k1, (IN_F, HID), jnp.float32, -0.1, 0.1)   # Linear(17, 200)
    b1 = jax.random.uniform(k2, (1, HID), jnp.float32, -0.1, 0.1)
    a1 = jnp.full((1, HID), 0.25, jnp.float32)                         # PReLU(200) default
    w2 = jax.random.uniform(k3, (HID, HID), jnp.float32, -0.07, 0.07)  # Linear(200, 200)
    b2 = jax.random.uniform(k4, (1, HID), jnp.float32, -0.07, 0.07)
    a2 = jnp.full((1, HID), 0.25, jnp.float32)                         # PReLU(200) default
    w3 = jax.random.uniform(k5, (HID, 1), jnp.float32, -0.07, 0.07)    # Linear(200, 1)
    b3 = jax.random.uniform(k6, (1, 1), jnp.float32, -0.07, 0.07)
    return (w1, b1, a1, w2, b2, a2, w3, b3)


def pack_params(raw):
    """Zero-pad hidden dim 200->256, cast MXU operands to bf16, pack small f32 vectors."""
    (w1, b1, a1, w2, b2, a2, w3, b3) = raw
    pad = HID_P - HID
    w1p = jnp.pad(w1, ((0, 0), (0, pad))).astype(jnp.bfloat16)          # (17, 256)
    w2p = jnp.pad(w2, ((0, pad), (0, pad))).astype(jnp.bfloat16)        # (256, 256)
    w3m = jnp.pad(w3.T, ((0, 7), (0, pad))).astype(jnp.bfloat16)        # (8, 256), row 0 = w3^T
    vec = jnp.concatenate(
        [
            jnp.pad(b1, ((0, 0), (0, pad))),      # row 0: b1
            jnp.pad(a1, ((0, 0), (0, pad))),      # row 1: a1
            jnp.pad(b2, ((0, 0), (0, pad))),      # row 2: b2
            jnp.pad(a2, ((0, 0), (0, pad))),      # row 3: a2
            jnp.zeros((4, HID_P), jnp.float32),   # rows 4-7: sublane padding
        ],
        axis=0,
    )                                                                   # (8, 256) f32
    return (w1p, w2p, w3m, vec, b3.astype(jnp.float32))


def reference_forward(x, raw):
    (w1, b1, a1, w2, b2, a2, w3, b3) = raw
    h1 = x @ w1 + b1
    h1 = jnp.where(h1 > 0, h1, a1 * h1)
    h2 = h1 @ w2 + b2
    h2 = jnp.where(h2 > 0, h2, a2 * h2)
    return h2 @ w3 + b3


if __name__ == "__main__":
    key = jax.random.PRNGKey(0)
    kx, kp = jax.random.split(key)

    raw_params = init_params(kp)
    params = pack_params(raw_params)

    # Small shape matching the module's DataLoader batch size.
    batch = 16
    x = jax.random.normal(kx, (batch, IN_F), jnp.float32)
    out = jax.block_until_ready(bp_forward(x, params))
    ref = reference_forward(x, raw_params)
    assert out.shape == (batch, 1)
    assert jnp.allclose(out, ref, atol=1e-2, rtol=2e-2)

    # Also exercise multi-tile grid + batch padding path.
    x2 = jax.random.normal(kx, (300, IN_F), jnp.float32)
    out2 = jax.block_until_ready(bp_forward(x2, params, tile_b=128))
    ref2 = reference_forward(x2, raw_params)
    assert out2.shape == (300, 1)
    assert jnp.allclose(out2, ref2, atol=1e-2, rtol=2e-2)

    print("KERNEL_OK")
</pallas_src>

<mosaic_0001>
module attributes {stable_mosaic.version = 11 : i64} {
  func.func @bp_forward_kernel(%arg0: i32, %arg1: memref<16x17xbf16, #tpu.memory_space<vmem>>, %arg2: memref<17x256xbf16, #tpu.memory_space<vmem>>, %arg3: memref<256x256xbf16, #tpu.memory_space<vmem>>, %arg4: memref<8x256xbf16, #tpu.memory_space<vmem>>, %arg5: memref<8x256xf32, #tpu.memory_space<vmem>>, %arg6: memref<1x1xf32, #tpu.memory_space<smem>>, %arg7: memref<1x1x16xf32, #tpu.memory_space<vmem>>) attributes {dimension_semantics = [#tpu.dimension_semantics<parallel>], iteration_bounds = array<i64: 1>, scalar_prefetch = 0 : i64, scratch_operands = 0 : i64, tpu.core_type = #tpu.core_type<tc>, window_params = [{transform_indices = @transform_0, window_bounds = array<i64: 16, 17>}, {pipeline_mode = #tpu.pipeline_mode<synchronous>, transform_indices = @transform_1, window_bounds = array<i64: 17, 256>}, {pipeline_mode = #tpu.pipeline_mode<synchronous>, transform_indices = @transform_2, window_bounds = array<i64: 256, 256>}, {pipeline_mode = #tpu.pipeline_mode<synchronous>, transform_indices = @transform_3, window_bounds = array<i64: 8, 256>}, {pipeline_mode = #tpu.pipeline_mode<synchronous>, transform_indices = @transform_4, window_bounds = array<i64: 8, 256>}, {transform_indices = @transform_5, window_bounds = array<i64: 1, 1>}, {transform_indices = @transform_6, window_bounds = array<i64: 1, 1, 16>}]} {
    %c0 = arith.constant 0 : index
    %c0_0 = arith.constant 0 : index
    %0 = vector.load %arg1[%c0, %c0_0] : memref<16x17xbf16, #tpu.memory_space<vmem>>, vector<16x17xbf16>
    %c0_1 = arith.constant 0 : index
    %c0_2 = arith.constant 0 : index
    %1 = vector.load %arg5[%c0_1, %c0_2] : memref<8x256xf32, #tpu.memory_space<vmem>>, vector<8x256xf32>
    %2 = vector.extract_strided_slice %1 {offsets = [0, 0], sizes = [1, 256], strides = [1, 1]} : vector<8x256xf32> to vector<1x256xf32>
    %3 = vector.extract_strided_slice %1 {offsets = [1, 0], sizes = [1, 256], strides = [1, 1]} : vector<8x256xf32> to vector<1x256xf32>
    %4 = vector.extract_strided_slice %1 {offsets = [2, 0], sizes = [1, 256], strides = [1, 1]} : vector<8x256xf32> to vector<1x256xf32>
    %5 = vector.extract_strided_slice %1 {offsets = [3, 0], sizes = [1, 256], strides = [1, 1]} : vector<8x256xf32> to vector<1x256xf32>
    %c0_3 = arith.constant 0 : index
    %c0_4 = arith.constant 0 : index
    %6 = vector.load %arg2[%c0_3, %c0_4] : memref<17x256xbf16, #tpu.memory_space<vmem>>, vector<17x256xbf16>
    %cst = arith.constant dense<0.000000e+00> : vector<16x256xf32>
    %7 = tpu.matmul %0, %6, %cst {dimension_numbers = #tpu.dot_dimension_numbers<[1], [0], [0], [1], [0, 0, 1, 1], [], []>} : vector<16x17xbf16>, vector<17x256xbf16>, vector<16x256xf32> -> vector<16x256xf32>
    %8 = vector.broadcast %2 : vector<1x256xf32> to vector<16x256xf32>
    %9 = arith.addf %7, %8 : vector<16x256xf32>
    %cst_5 = arith.constant 0.000000e+00 : f32
    %10 = vector.broadcast %cst_5 : f32 to vector<16x256xf32>
    %11 = arith.cmpf ogt, %9, %10 : vector<16x256xf32>
    %12 = vector.broadcast %3 : vector<1x256xf32> to vector<16x256xf32>
    %13 = arith.mulf %12, %9 : vector<16x256xf32>
    %14 = arith.select %11, %9, %13 : vector<16x256xi1>, vector<16x256xf32>
    %15 = arith.truncf %14 : vector<16x256xf32> to vector<16x256xbf16>
    %c0_6 = arith.constant 0 : index
    %c0_7 = arith.constant 0 : index
    %16 = vector.load %arg3[%c0_6, %c0_7] : memref<256x256xbf16, #tpu.memory_space<vmem>>, vector<256x256xbf16>
    %cst_8 = arith.constant dense<0.000000e+00> : vector<16x256xf32>
    %17 = tpu.matmul %15, %16, %cst_8 {dimension_numbers = #tpu.dot_dimension_numbers<[1], [0], [0], [1], [0, 0, 1, 1], [], []>} : vector<16x256xbf16>, vector<256x256xbf16>, vector<16x256xf32> -> vector<16x256xf32>
    %18 = vector.broadcast %4 : vector<1x256xf32> to vector<16x256xf32>
    %19 = arith.addf %17, %18 : vector<16x256xf32>
    %cst_9 = arith.constant 0.000000e+00 : f32
    %20 = vector.broadcast %cst_9 : f32 to vector<16x256xf32>
    %21 = arith.cmpf ogt, %19, %20 : vector<16x256xf32>
    %22 = vector.broadcast %5 : vector<1x256xf32> to vector<16x256xf32>
    %23 = arith.mulf %22, %19 : vector<16x256xf32>
    %24 = arith.select %21, %19, %23 : vector<16x256xi1>, vector<16x256xf32>
    %c0_10 = arith.constant 0 : index
    %c0_11 = arith.constant 0 : index
    %25 = vector.load %arg4[%c0_10, %c0_11] : memref<8x256xbf16, #tpu.memory_space<vmem>>, vector<8x256xbf16>
    %26 = arith.truncf %24 : vector<16x256xf32> to vector<16x256xbf16>
    %cst_12 = arith.constant dense<0.000000e+00> : vector<8x16xf32>
    %27 = tpu.matmul %25, %26, %cst_12 {dimension_numbers = #tpu.dot_dimension_numbers<[1], [1], [0], [0], [0, 0, 1, 0], [], []>} : vector<8x256xbf16>, vector<16x256xbf16>, vector<8x16xf32> -> vector<8x16xf32>
    %28 = vector.extract_strided_slice %27 {offsets = [0, 0], sizes = [1, 16], strides = [1, 1]} : vector<8x16xf32> to vector<1x16xf32>
    %c0_13 = arith.constant 0 : index
    %c0_14 = arith.constant 0 : index
    %29 = memref.load %arg6[%c0_13, %c0_14] : memref<1x1xf32, #tpu.memory_space<smem>>
    %30 = vector.broadcast %29 : f32 to vector<1x16xf32>
    %31 = arith.addf %28, %30 : vector<1x16xf32>
    %32 = vector.shape_cast %31 : vector<1x16xf32> to vector<1x1x16xf32>
    %c0_15 = arith.constant 0 : index
    %c0_16 = arith.constant 0 : index
    %c0_17 = arith.constant 0 : index
    %33 = vector.load %arg7[%c0_15, %c0_16, %c0_17] : memref<1x1x16xf32, #tpu.memory_space<vmem>>, vector<1x1x16xf32>
    tpu.vector_store %arg7[%c0_15, %c0_16, %c0_17], %32 {strides = array<i32>} : memref<1x1x16xf32, #tpu.memory_space<vmem>>, vector<1x1x16xf32>,
    return
  }
  func.func @transform_0(%arg0: i32) -> (i32, i32) {
    %c0_i32 = arith.constant 0 : i32
    %c0_i32_0 = arith.constant 0 : i32
    return %arg0, %c0_i32 : i32, i32
  }
  func.func @transform_1(%arg0: i32) -> (i32, i32) {
    %c0_i32 = arith.constant 0 : i32
    %c0_i32_0 = arith.constant 0 : i32
    %c0_i32_1 = arith.constant 0 : i32
    return %c0_i32, %c0_i32_0 : i32, i32
  }
  func.func @transform_2(%arg0: i32) -> (i32, i32) {
    %c0_i32 = arith.constant 0 : i32
    %c0_i32_0 = arith.constant 0 : i32
    %c0_i32_1 = arith.constant 0 : i32
    return %c0_i32, %c0_i32_0 : i32, i32
  }
  func.func @transform_3(%arg0: i32) -> (i32, i32) {
    %c0_i32 = arith.constant 0 : i32
    %c0_i32_0 = arith.constant 0 : i32
    %c0_i32_1 = arith.constant 0 : i32
    return %c0_i32, %c0_i32_0 : i32, i32
  }
  func.func @transform_4(%arg0: i32) -> (i32, i32) {
    %c0_i32 = arith.constant 0 : i32
    %c0_i32_0 = arith.constant 0 : i32
    %c0_i32_1 = arith.constant 0 : i32
    return %c0_i32, %c0_i32_0 : i32, i32
  }
  func.func @transform_5(%arg0: i32) -> (i32, i32) {
    %c0_i32 = arith.constant 0 : i32
    %c0_i32_0 = arith.constant 0 : i32
    %c0_i32_1 = arith.constant 0 : i32
    return %c0_i32, %c0_i32_0 : i32, i32
  }
  func.func @transform_6(%arg0: i32) -> (i32, i32, i32) {
    %c0_i32 = arith.constant 0 : i32
    %c0_i32_0 = arith.constant 0 : i32
    %c0_i32_1 = arith.constant 0 : i32
    return %arg0, %c0_i32, %c0_i32_0 : i32, i32, i32
  }
}

</mosaic_0001>

<bundles_post_ra>
// kernel: tpu_custom_call.1
= control target key start
LH: loop header
LB: loop body
LE: loop exit
PB: predicated region body
PF: predicated region fallthrough
CT: control target
= control target key end

     0   :  { %12 = vsyncpa [#allocation4], 0  ;;  %s923_s0 = inlined_call_operand.hbm [shape: bf16[16,17], index: 0, kind: input, shape index: {}]   ;;  %s924_s1 = inlined_call_operand.hbm [shape: bf16[17,256], index: 1, kind: input, shape index: {}]   ;;  %s925_s2 = inlined_call_operand.hbm [shape: bf16[256,256], index: 2, kind: input, shape index: {}]   ;;  %s926_s3 = inlined_call_operand.hbm [shape: bf16[8,256], index: 3, kind: input, shape index: {}]   ;;  %s927_s4 = inlined_call_operand.hbm [shape: f32[8,256], index: 4, kind: input, shape index: {}]   ;;  %s928_s5 = inlined_call_operand.<no memory space> [shape: f32[1,1], index: 5, kind: input, shape index: {}]   ;;  %s929_s6 = inlined_call_operand.hbm [shape: f32[1,1,16], index: 6, kind: output, shape index: {}]  }
   0x1   :  { %13 = vsyncpa [#allocation7], 0 }
   0x2   :  { %14 = vsyncpa [#allocation10], 0  ;;  %s33_s23 = sshll.u32 %s924_s1, 4  ;;  %s34_s23 = int_to_ptr.hbm [resolvable:$true] %s33_s23 }
   0x3   :  { %15 = vsyncpa [#allocation5], 0  ;;  %s850_s24 = smov [#allocation6]   ;;  %s60_s28 = sshll.u32 %s926_s3, 4  ;;  %s61_s28 = int_to_ptr.hbm [resolvable:$true] %s60_s28 }
   0x4   :  { %s35_s25 = sshll.u32 %s850_s24, 4  ;;  %s851_s29 = smov 128   ;;  %s36_s25 = int_to_ptr.vmem [resolvable:$true] %s35_s25 }
   0x5   :  { %s852_s30 = smov 8   ;;  %s853_s7 = smov [#allocation9]  }
   0x6   :  { %41 = dma.hbm_to_vmem [thread:$0]  %s34_s23, 384, %s36_s25, [#allocation7], %s851_s29, %s851_s29, %s852_s30  }
   0x7   :  { %s62_s8 = sshll.u32 %s853_s7, 4  ;;  %s20_s11 = sshll.u32 %s923_s0, 4  ;;  %s63_s8 = int_to_ptr.vmem [resolvable:$true] %s62_s8  ;;  %s21_s11 = int_to_ptr.hbm [resolvable:$true] %s20_s11 }
   0x8   :  { %65 = dma.hbm_to_vmem [thread:$0]  %s61_s28, 128, %s63_s8, [#allocation10]  }
   0x9   :  { %s854_s1 = smov [#allocation3]   ;;  %s46_s3 = sshll.u32 %s925_s2, 4  ;;  %s47_s3 = int_to_ptr.hbm [resolvable:$true] %s46_s3 }
   0xa   :  { %s22_s12 = sshll.u32 %s854_s1, 4  ;;  %s855_s15 = smov 64   ;;  %s23_s12 = int_to_ptr.vmem [resolvable:$true] %s22_s12 }
   0xb   :  { %s856_s16 = smov 4   ;;  %s857_s17 = smov [#allocation8]  }
   0xc   :  { %28 = dma.hbm_to_vmem [thread:$0]  %s21_s11, 128, %s23_s12, [#allocation4], %s855_s15, %s855_s15, %s856_s16  }
   0xd   :  { %s48_s18 = sshll.u32 %s857_s17, 4  ;;  %s71_s0 = sshll.u32 %s927_s4, 4  ;;  %s49_s18 = int_to_ptr.vmem [resolvable:$true] %s48_s18  ;;  %s72_s0 = int_to_ptr.hbm [resolvable:$true] %s71_s0 }
   0xe   :  { %54 = dma.hbm_to_vmem [thread:$0]  %s47_s3, 4096, %s49_s18, [#allocation7], %s851_s29, %s851_s29, %s852_s30  }
   0xf   :  { %s858_s21 = smov [#allocation11]  }
  0x10   :  { %s73_s22 = sshll.u32 %s858_s21, 4  ;;  %s74_s22 = int_to_ptr.vmem [resolvable:$true] %s73_s22 }
  0x11   :  { %76 = dma.hbm_to_vmem [thread:$0]  %s72_s0, 256, %s74_s22, [#allocation10]  }
  0x12   :  { %842 = dma.done.wait [#allocation4], 128  }
  0x13   :  { %843 = vsyncadd [#allocation4], 4294967168 }
  0x14   :  { %844 = dma.done.wait [#allocation7], 4480  }
  0x15   :  { %845 = vsyncadd [#allocation7], 4294962816 }
  0x16   :  { %846 = dma.done.wait [#allocation10], 384  }
  0x17   :  { %847 = vsyncadd [#allocation10], 4294966912  ;;  %vm133_vm0 = vcmask 1040384   ;;  %v106_v0 = vld [vmem:[#allocation6 + $0x10] sm:$0x11]  ;;  %v859_v2 = vmov 0  }
  0x18   :  { %v121_v1 = vunpack.c.l.b16 %v106_v0  ;;  %v135_v3 = vsel %vm133_vm0, 65535, %v859_v2  ;;  %v122_v4 = vunpack.c.h.b16 %v106_v0  ;;  %v516_v5 = vld [vmem:[#allocation6] sm:$0xf]  ;;  %v654_v6 = vld [vmem:[#allocation6 + $0x4] sm:$0xf0]  ;;  %v652_v42 = vld [vmem:[#allocation3] sm:$0xff] }
  0x19   :  { %v653_v7 = vld [vmem:[#allocation6 + $0x4] sm:$0xf]  ;;  %v518_v8 = vld [vmem:[#allocation6 + $0x8] sm:$0xf0]  ;;  %v582_v9 = vld [vmem:[#allocation8 + $0x70] sm:$0xf]  ;;  %v517_v29 = vor.u32 %v654_v6, %v516_v5 }
  0x1a   :  { %v670_v10 = vld [vmem:[#allocation8 + $0x74] sm:$0xf0]  ;;  %v646_v11 = vld [vmem:[#allocation8 + $0xf0] sm:$0xf]  ;;  %v125_v12 = vpack.c.b16 %v121_v1, %v121_v1  ;;  %v126_v13 = vpack.c.b16 %v122_v4, %v122_v4  ;;  %v669_v16 = vld [vmem:[#allocation8 + $0x74] sm:$0xf]  ;;  %v521_v30 = vor.u32 %v653_v7, %v518_v8 }
  0x1b   :  { %v583_v14 = vor.u32 %v670_v10, %v582_v9  ;;  %v686_v15 = vld [vmem:[#allocation8 + $0xf4] sm:$0xf0]  ;;  %v584_v17 = vld [vmem:[#allocation8 + $0x78] sm:$0xf0]  ;;  %v685_v19 = vld [vmem:[#allocation8 + $0xf4] sm:$0xf] }
  0x1c   :  { %v647_v18 = vor.u32 %v686_v15, %v646_v11  ;;  %v648_v20 = vld [vmem:[#allocation8 + $0xf8] sm:$0xf0]  ;;  %v574_v21 = vld [vmem:[#allocation8 + $0x60] sm:$0xf]  ;;  %v137_v22 = vand.u32 %v135_v3, %v125_v12  ;;  %v140_v23 = vand.u32 %v135_v3, %v126_v13  ;;  %v668_v24 = vld [vmem:[#allocation8 + $0x64] sm:$0xf0]  ;;  %v587_v33 = vor.u32 %v669_v16, %v584_v17 }
  0x1d   :  { %380 = vmatpush.bf16.msra.mxu2 %v583_v14  ;;  %v638_v25 = vld [vmem:[#allocation8 + $0xe0] sm:$0xf]  ;;  %v684_v26 = vld [vmem:[#allocation8 + $0xe4] sm:$0xf0]  ;;  %v575_v27 = vor.u32 %v668_v24, %v574_v21  ;;  %v566_v31 = vld [vmem:[#allocation8 + $0x50] sm:$0xf]  ;;  %v651_v34 = vor.u32 %v685_v19, %v648_v20 }
  0x1e   :  { %394 = vmatpush.bf16.msra.mxu3 %v647_v18  ;;  %v639_v28 = vor.u32 %v684_v26, %v638_v25  ;;  %148 = vmatpush.bf16.msra.mxu0 %v137_v22  ;;  %v666_v32 = vld [vmem:[#allocation8 + $0x54] sm:$0xf0]  ;;  %v667_v35 = vld [vmem:[#allocation8 + $0x64] sm:$0xf]  ;;  %v630_v36 = vld [vmem:[#allocation8 + $0xd0] sm:$0xf] }
  0x1f   :  { %162 = vmatpush.bf16.msra.mxu1 %v140_v23  ;;  %v682_v37 = vld [vmem:[#allocation8 + $0xd4] sm:$0xf0]  ;;  %v576_v38 = vld [vmem:[#allocation8 + $0x68] sm:$0xf0]  ;;  %v683_v39 = vld [vmem:[#allocation8 + $0xe4] sm:$0xf]  ;;  %v567_v41 = vor.u32 %v666_v32, %v566_v31 }
  0x20   :  { %v640_v40 = vld [vmem:[#allocation8 + $0xe8] sm:$0xf0]  ;;  %v558_v43 = vld [vmem:[#allocation8 + $0x40] sm:$0xf]  ;;  %v664_v44 = vld [vmem:[#allocation8 + $0x44] sm:$0xf0]  ;;  %v631_v45 = vor.u32 %v682_v37, %v630_v36  ;;  %v579_v46 = vor.u32 %v667_v35, %v576_v38 }
  0x21   :  { %381 = vmatpush.bf16.msra.mxu2 %v575_v27  ;;  %vm129_vm1 = vcmask 138240   ;;  %v643_v47 = vor.u32 %v683_v39, %v640_v40  ;;  %v665_v48 = vld [vmem:[#allocation8 + $0x54] sm:$0xf]  ;;  %v622_v49 = vld [vmem:[#allocation8 + $0xc0] sm:$0xf]  ;;  %v559_v54 = vor.u32 %v664_v44, %v558_v43  ;;  %s860_s23 = smov [#allocation12]  }
  0x22   :  { %395 = vmatpush.bf16.msra.mxu3 %v639_v28  ;;  %149 = vmatpush.bf16.msra.mxu0 %v517_v29  ;;  %v680_v50 = vld [vmem:[#allocation8 + $0xc4] sm:$0xf0]  ;;  %v568_v51 = vld [vmem:[#allocation8 + $0x58] sm:$0xf0]  ;;  %v681_v52 = vld [vmem:[#allocation8 + $0xd4] sm:$0xf] }
  0x23   :  { %163 = vmatpush.bf16.msra.mxu1 %v521_v30  ;;  %v632_v53 = vld [vmem:[#allocation8 + $0xd8] sm:$0xf0]  ;;  %v623_v55 = vor.u32 %v680_v50, %v622_v49  ;;  %v571_v56 = vor.u32 %v665_v48, %v568_v51  ;;  %v663_v58 = vld [vmem:[#allocation8 + $0x44] sm:$0xf]  ;;  %v560_v59 = vld [vmem:[#allocation8 + $0x48] sm:$0xf0] }
  0x24   :  { %v635_v57 = vor.u32 %v681_v52, %v632_v53  ;;  %v679_v60 = vld [vmem:[#allocation8 + $0xc4] sm:$0xf]  ;;  %v624_v61 = vld [vmem:[#allocation8 + $0xc8] sm:$0xf0]  ;;  %v563_v62 = vor.u32 %v663_v58, %v560_v59  ;;  %v550_v0 = vld [vmem:[#allocation8 + $0x30] sm:$0xf] }
  0x25   :  { %382 = vmatpush.bf16.msra.mxu2 %v567_v41  ;;  %522 = vmatmul.msk.bf16.vlgmr.msra.gmra.mxu0 %vm129_vm1, %v652_v42  ;;  %v627_v63 = vor.u32 %v679_v60, %v624_v61  ;;  %v662_v1 = vld [vmem:[#allocation8 + $0x34] sm:$0xf0]  ;;  %v614_v3 = vld [vmem:[#allocation8 + $0xb0] sm:$0xf]  ;;  %v661_v6 = vld [vmem:[#allocation8 + $0x34] sm:$0xf] }
  0x26   :  { %408 = vmatpush.bf16.msrb.mxu0 %v587_v33  ;;  %523 = vmatmul.msk.bf16.vlgmr.msra.gmra.mxu1 %vm129_vm1, %v652_v42  ;;  %v551_v2 = vor.u32 %v662_v1, %v550_v0  ;;  %v678_v4 = vld [vmem:[#allocation8 + $0xb4] sm:$0xf0]  ;;  %v552_v7 = vld [vmem:[#allocation8 + $0x38] sm:$0xf0]  ;;  %v677_v8 = vld [vmem:[#allocation8 + $0xb4] sm:$0xf] }
  0x27   :  { %422 = vmatpush.bf16.msrb.mxu1 %v651_v34  ;;  %396 = vmatpush.bf16.msra.mxu3 %v631_v45  ;;  %v615_v5 = vor.u32 %v678_v4, %v614_v3  ;;  %v555_v9 = vor.u32 %v661_v6, %v552_v7  ;;  %v616_v10 = vld [vmem:[#allocation8 + $0xb8] sm:$0xf0]  ;;  %v542_v12 = vld [vmem:[#allocation8 + $0x20] sm:$0xf]  ;;  %v660_v13 = vld [vmem:[#allocation8 + $0x24] sm:$0xf0] }
  0x28   :  { %v619_v11 = vor.u32 %v677_v8, %v616_v10  ;;  %v606_v14 = vld [vmem:[#allocation8 + $0xa0] sm:$0xf]  ;;  %v543_v15 = vor.u32 %v660_v13, %v542_v12  ;;  %v676_v16 = vld [vmem:[#allocation8 + $0xa4] sm:$0xf0]  ;;  %v659_v17 = vld [vmem:[#allocation8 + $0x24] sm:$0xf] }
  0x29   :  { %383 = vmatpush.bf16.msra.mxu2 %v559_v54  ;;  %v544_v18 = vld [vmem:[#allocation8 + $0x28] sm:$0xf0]  ;;  %v607_v19 = vor.u32 %v676_v16, %v606_v14  ;;  %v675_v21 = vld [vmem:[#allocation8 + $0xa4] sm:$0xf]  ;;  %v534_v24 = vld [vmem:[#allocation8 + $0x10] sm:$0xf] }
  0x2a   :  { %409 = vmatpush.bf16.msrb.mxu0 %v579_v46  ;;  %v547_v20 = vor.u32 %v659_v17, %v544_v18  ;;  %v608_v22 = vld [vmem:[#allocation8 + $0xa8] sm:$0xf0]  ;;  %v658_v25 = vld [vmem:[#allocation8 + $0x14] sm:$0xf0]  ;;  %v598_v26 = vld [vmem:[#allocation8 + $0x90] sm:$0xf] }
  0x2b   :  { %423 = vmatpush.bf16.msrb.mxu1 %v643_v47  ;;  %397 = vmatpush.bf16.msra.mxu3 %v623_v55  ;;  %v611_v23 = vor.u32 %v675_v21, %v608_v22  ;;  %v535_v27 = vor.u32 %v658_v25, %v534_v24  ;;  %v674_v28 = vld [vmem:[#allocation8 + $0x94] sm:$0xf0]  ;;  %v657_v29 = vld [vmem:[#allocation8 + $0x14] sm:$0xf]  ;;  %v536_v30 = vld [vmem:[#allocation8 + $0x18] sm:$0xf0] }
  0x2c   :  { %v599_v31 = vor.u32 %v674_v28, %v598_v26  ;;  %v539_v32 = vor.u32 %v657_v29, %v536_v30  ;;  %v673_v33 = vld [vmem:[#allocation8 + $0x94] sm:$0xf]  ;;  %v600_v34 = vld [vmem:[#allocation8 + $0x98] sm:$0xf0]  ;;  %v526_v36 = vld [vmem:[#allocation8] sm:$0xf] }
  0x2d   :  { %384 = vmatpush.bf16.msra.mxu2 %v551_v2  ;;  %v603_v35 = vor.u32 %v673_v33, %v600_v34  ;;  %v656_v37 = vld [vmem:[#allocation8 + $0x4] sm:$0xf0]  ;;  %v590_v38 = vld [vmem:[#allocation8 + $0x80] sm:$0xf]  ;;  %v655_v41 = vld [vmem:[#allocation8 + $0x4] sm:$0xf] }
  0x2e   :  { %410 = vmatpush.bf16.msrb.mxu0 %v571_v56  ;;  %v527_v39 = vor.u32 %v656_v37, %v526_v36  ;;  %v672_v40 = vld [vmem:[#allocation8 + $0x84] sm:$0xf0]  ;;  %v528_v42 = vld [vmem:[#allocation8 + $0x8] sm:$0xf0]  ;;  %v671_v45 = vld [vmem:[#allocation8 + $0x84] sm:$0xf] }
  0x2f   :  { %424 = vmatpush.bf16.msrb.mxu1 %v635_v57  ;;  %398 = vmatpush.bf16.msra.mxu3 %v615_v5  ;;  %v591_v43 = vor.u32 %v672_v40, %v590_v38  ;;  %v531_v44 = vor.u32 %v655_v41, %v528_v42  ;;  %v592_v46 = vld [vmem:[#allocation8 + $0x88] sm:$0xf0]  ;;  %v103_v49 = vld [vmem:[#allocation11 + $0x8] sm:$0xff]  ;;  %v450_v28 = vld [vmem:[#allocation9] sm:$0xff]  ;;  %s496_s24 = sshll.u32 %s860_s23, 4  ;;  %s498_s27 = sshll.u32 %s929_s6, 4  ;;  %s497_s24 = int_to_ptr.vmem [resolvable:$true] %s496_s24  ;;  %s499_s27 = int_to_ptr.hbm [resolvable:$true] %s498_s27 }
  0x30   :  { %v595_v47 = vor.u32 %v671_v45, %v592_v46  ;;  %v911_v48 = vld [vmem:[#allocation11] sm:$0xff]  ;;  %v108_v53 = vperm.slane %v103_v49, 0  ;;  %v175_v57 = vperm.slane %v103_v49, 1  ;;  %v219_v8 = vperm.slane %v103_v49, 2 }
  0x31   :  { %385 = vmatpush.bf16.msra.mxu2 %v543_v15  ;;  %v107_v52 = vperm.slane %v911_v48, 0  ;;  %v174_v55 = vperm.slane %v911_v48, 1  ;;  %v218_v12 = vperm.slane %v911_v48, 2  ;;  %v441_v16 = vperm.slane %v103_v49, 3 }
  0x32   :  { %411 = vmatpush.bf16.msrb.mxu0 %v563_v62  ;;  %v440_v24 = vperm.slane %v911_v48, 3  ;;  %v454_v41 = vunpack.c.l.b16 %v450_v28  ;;  %v487_v45 = vstv %s928_s5  ;;  %vm489_vm10 = vcmask 122880  }
  0x33   :  { %425 = vmatpush.bf16.msrb.mxu1 %v627_v63  ;;  %399 = vmatpush.bf16.msra.mxu3 %v607_v19 }
  0x34   :  { %v456_v42 = vpack.c.b16 %v454_v41, %v454_v41 }
  0x35   :  { %386 = vmatpush.bf16.msra.mxu2 %v535_v27 }
  0x36   :  { %412 = vmatpush.bf16.msrb.mxu0 %v555_v9 }
  0x37   :  { %426 = vmatpush.bf16.msrb.mxu1 %v619_v11  ;;  %400 = vmatpush.bf16.msra.mxu3 %v599_v31 }
  0x39   :  { %387 = vmatpush.bf16.msra.mxu2 %v527_v39 }
  0x3a   :  { %413 = vmatpush.bf16.msrb.mxu0 %v547_v20 }
  0x3b   :  { %427 = vmatpush.bf16.msrb.mxu1 %v611_v23  ;;  %401 = vmatpush.bf16.msra.mxu3 %v591_v43 }
  0x3e   :  { %414 = vmatpush.bf16.msrb.mxu0 %v539_v32 }
  0x3f   :  { %428 = vmatpush.bf16.msrb.mxu1 %v603_v35  ;;  %v455_v35 = vunpack.c.h.b16 %v450_v28 }
  0x41   :  { %v457_v40 = vpack.c.b16 %v455_v35, %v455_v35 }
  0x42   :  { %415 = vmatpush.bf16.msrb.mxu0 %v531_v44 }
  0x43   :  { %429 = vmatpush.bf16.msrb.mxu1 %v595_v47 }
  0xa2   :  { %v151_v50 = vpop.f32.mrf.mxu0 }
  0xa3   :  { %v165_v51 = vpop.f32.mrf.mxu1  ;;  %v152_v54 = vadd.f32 %v151_v50, %v107_v52 }
  0xa4   :  { %v166_v56 = vadd.f32 %v165_v51, %v108_v53 }
  0xa5   :  { %v176_v60 = vmul.f32 %v174_v55, %v152_v54  ;;  %vm170_vm2 = vcmp.gt.f32.partialorder %v152_v54, 0.0 }
  0xa6   :  { %v177_v61 = vmul.f32 %v175_v57, %v166_v56  ;;  %vm171_vm3 = vcmp.gt.f32.partialorder %v166_v56, 0.0 }
  0xa7   :  { %v180_v2 = vsel %vm170_vm2, %v152_v54, %v176_v60 }
  0xa8   :  { %v181_v4 = vsel %vm171_vm3, %v166_v56, %v177_v61 }
  0xaa   :  { %v153_v58 = vpop.f32.mrf.mxu0 }
  0xab   :  { %v167_v59 = vpop.f32.mrf.mxu1  ;;  %v154_v62 = vadd.f32 %v153_v58, %v107_v52 }
  0xac   :  { %v168_v63 = vadd.f32 %v167_v59, %v108_v53 }
  0xad   :  { %v178_v0 = vmul.f32 %v174_v55, %v154_v62  ;;  %vm172_vm4 = vcmp.gt.f32.partialorder %v154_v62, 0.0 }
  0xae   :  { %v179_v1 = vmul.f32 %v175_v57, %v168_v63  ;;  %vm173_vm5 = vcmp.gt.f32.partialorder %v168_v63, 0.0 }
  0xaf   :  { %v182_v3 = vsel %vm172_vm4, %v154_v62, %v178_v0 }
  0xb0   :  { %v183_v5 = vsel %vm173_vm5, %v168_v63, %v179_v1  ;;  %v184_v6 = vpack.c.bf16 %v182_v3, %v180_v2 }
  0xb1   :  { %v185_v7 = vpack.c.bf16 %v183_v5, %v181_v4 }
  0xb2   :  { %388 = vmatmul.bf16.vlgmr.msra.gmra.mxu2 %v184_v6  ;;  %416 = vmatmul.bf16.vlgmr.msrb.gmra.mxu0 %v184_v6 }
  0xb3   :  { %402 = vmatmul.bf16.vlgmr.msra.gmra.mxu3 %v185_v7  ;;  %430 = vmatmul.bf16.vlgmr.msrb.gmra.mxu1 %v185_v7 }
 0x12f   :  { %v417_v9 = vpop.f32.mrf.mxu0 }
 0x130   :  { %v431_v10 = vpop.f32.mrf.mxu1  ;;  %v418_v11 = vadd.f32 %v417_v9, %v219_v8 }
 0x132   :  { %v432_v15 = vadd.f32 %v431_v10, %v418_v11 }
 0x134   :  { %v443_v21 = vmul.f32 %v441_v16, %v432_v15  ;;  %vm437_vm6 = vcmp.gt.f32.partialorder %v432_v15, 0.0 }
 0x135   :  { %v389_v13 = vpop.f32.mrf.mxu2 }
 0x136   :  { %v403_v14 = vpop.f32.mrf.mxu3  ;;  %v390_v17 = vadd.f32 %v389_v13, %v218_v12  ;;  %v447_v30 = vsel %vm437_vm6, %v432_v15, %v443_v21 }
 0x137   :  { %v419_v18 = vpop.f32.mrf.mxu0 }
 0x138   :  { %v420_v19 = vadd.f32 %v419_v18, %v219_v8  ;;  %v433_v20 = vpop.f32.mrf.mxu1  ;;  %v404_v23 = vadd.f32 %v403_v14, %v390_v17 }
 0x13a   :  { %v434_v22 = vadd.f32 %v433_v20, %v420_v19  ;;  %v442_v32 = vmul.f32 %v440_v24, %v404_v23  ;;  %vm436_vm8 = vcmp.gt.f32.partialorder %v404_v23, 0.0 }
 0x13c   :  { %v445_v25 = vmul.f32 %v441_v16, %v434_v22  ;;  %vm439_vm7 = vcmp.gt.f32.partialorder %v434_v22, 0.0  ;;  %v446_v37 = vsel %vm436_vm8, %v404_v23, %v442_v32 }
 0x13d   :  { %v391_v26 = vpop.f32.mrf.mxu2 }
 0x13e   :  { %v392_v27 = vadd.f32 %v391_v26, %v218_v12  ;;  %v405_v29 = vpop.f32.mrf.mxu3  ;;  %v449_v31 = vsel %vm439_vm7, %v434_v22, %v445_v25 }
 0x13f   :  { %v452_v34 = vpack.c.bf16 %v449_v31, %v447_v30 }
 0x140   :  { %v406_v33 = vadd.f32 %v405_v29, %v392_v27 }
 0x141   :  { %480 = vmatpush.bf16.xpose.msrb.mxu3 %v452_v34 }
 0x142   :  { %v444_v36 = vmul.f32 %v440_v24, %v406_v33  ;;  %vm438_vm9 = vcmp.gt.f32.partialorder %v406_v33, 0.0 }
 0x144   :  { %v448_v38 = vsel %vm438_vm9, %v406_v33, %v444_v36 }
 0x145   :  { %v451_v39 = vpack.c.bf16 %v448_v38, %v446_v37 }
 0x147   :  { %467 = vmatpush.bf16.xpose.msrb.mxu2 %v451_v39 }
 0x148   :  { %481 = vmatmul.bf16.vlgmr.msrb.gmra.mxu3 %v457_v40 }
 0x14e   :  { %468 = vmatmul.bf16.vlgmr.msrb.gmra.mxu2 %v456_v42 }
 0x1cb   :  { %v482_v43 = vpop.f32.mrf.mxu3 }
 0x1d1   :  { %v469_v44 = vpop.f32.mrf.mxu2 }
 0x1d2   :  { %v483_v46 = vadd.f32 %v482_v43, %v469_v44 }
 0x1d3   :  { %v484_v48 = vpop.f32.mrf.mxu3 }
 0x1d4   :  { %v488_v47 = vadd.f32 %v487_v45, %v483_v46 }
 0x1d6   :  { %490 = vst.msk [vmem:[#allocation12] sm:$0x1] %vm489_vm10, %v488_v47 }
 0x1d7   :  { %501 = dma.vmem_to_hbm [thread:$0]  %s497_s24, 16, %s499_s27, [#allocation5]  }
 0x1d9   :  { %v471_v49 = vpop.f32.mrf.mxu2 }
 0x1da   :  { %848 = dma.done.wait [#allocation5], 16  }
 0x1db   :  { %849 = vsyncadd [#allocation5], 4294967280 }
 0x1dc   :  { %506 = vsyncpa [#allocation4], 1 }
 0x1dd   :  { %507 = vsyncpa [#allocation7], 1 }
 0x1de   :  { %508 = vsyncpa [#allocation10], 1 }
 0x1df   :  { %509 = vsyncpa [#allocation5], 1 }

</bundles_post_ra>
